<compile_context>
chip_gen: v6e
topology: v6e:2x2x1
jax: 0.10.0
libtpu: 0.0.40
codegen_flags: <defaults>
</compile_context>

<pallas_src>
import jax
import jax.numpy as jnp
from jax.experimental import pallas as pl
from jax.experimental.pallas import tpu as pltpu

_CHUNK_THRESHOLD_BYTES = 1 << 20   # only chunk the DMA when there is >= 1 MiB
_MAX_OUTSTANDING_DMAS = 4          # 2-4 outstanding copies is plenty


def identity(x):
    """Forward pass of nn.Identity: return x.  No copy, no HBM traffic."""
    return x


def _make_dma_copy_kernel(splits):
    """Build a kernel that copies src -> dst via HBM->HBM DMAs.

    `splits` is a static list of (start, size) pairs along axis 0; an empty
    list means "copy the whole array with a single DMA".
    """

    def kernel(x_hbm, o_hbm, sem):
        if not splits:
            cp = pltpu.make_async_copy(x_hbm, o_hbm, sem.at[0])
            cp.start()
            cp.wait()
            return
        copies = []
        for i, (start, size) in enumerate(splits):
            cp = pltpu.make_async_copy(
                x_hbm.at[pl.ds(start, size)],
                o_hbm.at[pl.ds(start, size)],
                sem.at[i],
            )
            cp.start()                 # issue every chunk before waiting on any
            copies.append(cp)
        for cp in copies:
            cp.wait()

    return kernel


def identity_copy(x):
    """Pallas kernel producing a bit-exact physical copy of x (same shape/dtype)."""
    x = jnp.asarray(x)
    if x.size == 0:
        return x                       # nothing to copy
    if x.ndim == 0:                    # trivial scalar: copy via a (1, 1) view
        return identity_copy(x.reshape(1, 1)).reshape(())

    nbytes = x.size * x.dtype.itemsize

    # Static chunking along the leading (major) dimension only: slices of a
    # major dim are layout-clean for DMA regardless of the (8,128) tiling of
    # the trailing dims.  Small arrays get one whole-array DMA.
    splits = []
    if x.ndim >= 2 and x.shape[0] >= 2 and nbytes >= _CHUNK_THRESHOLD_BYTES:
        num_chunks = min(_MAX_OUTSTANDING_DMAS, x.shape[0])
        base, rem = divmod(x.shape[0], num_chunks)
        start = 0
        for i in range(num_chunks):
            size = base + (1 if i < rem else 0)
            splits.append((start, size))
            start += size
    num_sems = max(1, len(splits))

    kernel = _make_dma_copy_kernel(splits)
    return pl.pallas_call(
        kernel,
        out_shape=jax.ShapeDtypeStruct(x.shape, x.dtype),
        in_specs=[pl.BlockSpec(memory_space=pl.ANY)],
        out_specs=pl.BlockSpec(memory_space=pl.ANY),
        scratch_shapes=[pltpu.SemaphoreType.DMA((num_sems,))],
        cost_estimate=pl.CostEstimate(
            flops=0, transcendentals=0, bytes_accessed=2 * nbytes),
    )(x)


if __name__ == "__main__":
    key = jax.random.PRNGKey(0)

    # Small NCHW input consistent with a conv-style module: (2, 4, 16, 16).
    x = jax.random.normal(key, (2, 4, 16, 16), dtype=jnp.float32)

    # True Identity forward: zero-cost pass-through (object identity only
    # holds when called eagerly; under jit it is a traced value).
    y = identity(x)
    assert y is x

    # Pallas physical-copy path, single whole-array DMA (< 1 MiB).
    y_copy = jax.block_until_ready(identity_copy(x))
    assert y_copy.shape == x.shape
    assert y_copy.dtype == x.dtype
    assert jnp.array_equal(y_copy, x)

    # Same kernel under jit.
    y_jit = jax.block_until_ready(jax.jit(identity_copy)(x))
    assert jnp.array_equal(y_jit, x)

    # Exercise the chunked multi-DMA path (>= 1 MiB -> 4 outstanding DMAs).
    x_big = jax.random.normal(key, (8, 64, 512), dtype=jnp.float32)
    y_big = jax.block_until_ready(identity_copy(x_big))
    assert jnp.array_equal(y_big, x_big)

    print("KERNEL_OK")
</pallas_src>

<mosaic_0001>
module attributes {stable_mosaic.version = 11 : i64} {
  func.func @kernel(%arg0: memref<2x4x16x16xf32, #tpu.memory_space<any>>, %arg1: memref<2x4x16x16xf32, #tpu.memory_space<any>>, %arg2: memref<1x!tpu.dma_semaphore, #tpu.memory_space<semaphore_mem>>) attributes {dimension_semantics = [], scalar_prefetch = 0 : i64, scratch_operands = 1 : i64, tpu.core_type = #tpu.core_type<tc>} {
    %c0_i32 = arith.constant 0 : i32
    %0 = tpu.memref_slice %arg2[%c0_i32] : memref<1x!tpu.dma_semaphore, #tpu.memory_space<semaphore_mem>> -> memref<1x!tpu.dma_semaphore, #tpu.memory_space<semaphore_mem>>
    %1 = tpu.memref_squeeze %0 : memref<1x!tpu.dma_semaphore, #tpu.memory_space<semaphore_mem>> -> memref<!tpu.dma_semaphore, #tpu.memory_space<semaphore_mem>>
    tpu.enqueue_dma source(%arg0 : memref<2x4x16x16xf32, #tpu.memory_space<any>>) target(%arg1 : memref<2x4x16x16xf32, #tpu.memory_space<any>>) target_semaphore(%1 : memref<!tpu.dma_semaphore, #tpu.memory_space<semaphore_mem>>)
    %c0_i32_0 = arith.constant 0 : i32
    %2 = tpu.memref_slice %arg2[%c0_i32_0] : memref<1x!tpu.dma_semaphore, #tpu.memory_space<semaphore_mem>> -> memref<1x!tpu.dma_semaphore, #tpu.memory_space<semaphore_mem>>
    %3 = tpu.memref_squeeze %2 : memref<1x!tpu.dma_semaphore, #tpu.memory_space<semaphore_mem>> -> memref<!tpu.dma_semaphore, #tpu.memory_space<semaphore_mem>>
    tpu.wait_dma2 semaphore(%3 : memref<!tpu.dma_semaphore, #tpu.memory_space<semaphore_mem>>) src(%arg0 : memref<2x4x16x16xf32, #tpu.memory_space<any>>) dst(%arg1 : memref<2x4x16x16xf32, #tpu.memory_space<any>>)
    return
  }
}

</mosaic_0001>

<bundles_post_ra>
// kernel: tpu_custom_call.1
= control target key start
LH: loop header
LB: loop body
LE: loop exit
PB: predicated region body
PF: predicated region fallthrough
CT: control target
= control target key end

     0   :  { %s30_s6 = smov [#allocation2]   ;;  %s31_s7 = smov 131072   ;;  %s49_s0 = inlined_call_operand.hbm [shape: f32[2,4,16,16], index: 0, kind: input, shape index: {}]   ;;  %s50_s1 = inlined_call_operand.hbm [shape: f32[2,4,16,16], index: 1, kind: output, shape index: {}]  }
   0x1   :  { %s32_s8 = smov 0  }
   0x2   :  { %12 = dma.general %s49_s0, 2048, %s50_s1, %s30_s6, %s31_s7, [#allocation4], %s32_s8, 0  }
   0x3   :  { %28 = dma.done.wait [#allocation2], 2048 }
   0x4   :  { %29 = vsyncadd [#allocation2], 4294965248 }
   0x5   :  { %18 = vsyncmov [#allocation2] }
   0x8   :  { %s19_s13 = vpop.sfrf %18 }
   0x9   :  { %p24_p0 = scmp.ne.s32.totalorder %s19_s13, 0 }
   0xb   :  { %23 = shalt.err (%p24_p0)  }

</bundles_post_ra>
